<compile_context>
chip_gen: v7x
topology: tpu7x:2x2x1
jax: 0.10.0
libtpu: 0.0.40
codegen_flags: <defaults>
</compile_context>

<pallas_src>
import jax
import jax.numpy as jnp
import numpy as np
from jax.experimental import pallas as pl
from jax.experimental.pallas import tpu as pltpu


# ----------------------------------------------------------------------------
# Fused MLP kernel: refs = (x, W0, b0, W1, b1, ..., W_{L-1}, b_{L-1}, out)
# ----------------------------------------------------------------------------
def _make_mlp_kernel(num_layers):
    def kernel(*refs):
        x_ref = refs[0]
        o_ref = refs[-1]
        wb = refs[1:-1]

        h = x_ref[...].astype(jnp.float32)
        for l in range(num_layers):
            w = wb[2 * l][...]
            b = wb[2 * l + 1][...]          # (1, dout_l), broadcasts over rows
            h = jnp.dot(h, w, preferred_element_type=jnp.float32) + b
            if l < num_layers - 1:
                h = jnp.maximum(h, 0.0)     # ReLU between hidden layers

        # Numerically stable softmax over the last dim (matches F.softmax).
        m = jnp.max(h, axis=-1, keepdims=True)
        e = jnp.exp(h - m)
        o_ref[...] = (e / jnp.sum(e, axis=-1, keepdims=True)).astype(o_ref.dtype)

    return kernel


def _round_up(a, b):
    return ((a + b - 1) // b) * b


def fffastnet_forward(x, weights, biases, *, tile_m=256):
    """x: (N, num_ins); weights[l]: (d_in_l, d_out_l); biases[l]: (d_out_l,)."""
    n, din = x.shape
    dout = weights[-1].shape[1]
    num_layers = len(weights)

    # Row tile: multiple of 8 sublanes, no bigger than the (padded) batch.
    tm = _round_up(min(tile_m, _round_up(n, 8)), 8)
    n_pad = _round_up(n, tm)
    if n_pad != n:
        x = jnp.pad(x, ((0, n_pad - n), (0, 0)))

    in_specs = [pl.BlockSpec((tm, din), lambda i: (i, 0))]
    operands = [x]
    for w, b in zip(weights, biases):
        b2 = b.reshape(1, -1)
        # Grid-invariant weights/biases: constant index_map, stays in VMEM.
        in_specs.append(pl.BlockSpec(w.shape, lambda i: (0, 0)))
        in_specs.append(pl.BlockSpec(b2.shape, lambda i: (0, 0)))
        operands += [w, b2]

    out = pl.pallas_call(
        _make_mlp_kernel(num_layers),
        out_shape=jax.ShapeDtypeStruct((n_pad, dout), jnp.float32),
        grid=(n_pad // tm,),
        in_specs=in_specs,
        out_specs=pl.BlockSpec((tm, dout), lambda i: (i, 0)),
        compiler_params=pltpu.CompilerParams(
            dimension_semantics=("parallel",)),
    )(*operands)
    return out[:n]


# ----------------------------------------------------------------------------
# Pure-JAX reference (mirrors the PyTorch forward exactly) for validation.
# ----------------------------------------------------------------------------
def reference_forward(x, weights, biases):
    h = x
    for w, b in zip(weights[:-1], biases[:-1]):
        h = jax.nn.relu(h @ w + b)
    return jax.nn.softmax(h @ weights[-1] + biases[-1], axis=-1)


if __name__ == "__main__":
    num_ins, num_outs = 16, 8
    hid_shapes = (128, 128, 128, 128)   # module default
    batch = 16

    key = jax.random.PRNGKey(0)
    k_x, k_p = jax.random.split(key)
    x = jax.random.normal(k_x, (batch, num_ins), dtype=jnp.float32)

    # PyTorch init: W0 = rand(in, out) - 0.5 ; b0 = rand(out) - 0.5
    dims = (num_ins,) + hid_shapes + (num_outs,)
    keys = jax.random.split(k_p, 2 * (len(dims) - 1))
    W0s, b0s = [], []
    for l, (di, do) in enumerate(zip(dims[:-1], dims[1:])):
        W0s.append(jax.random.uniform(keys[2 * l], (di, do), jnp.float32,
                                      -0.5, 0.5))
        b0s.append(jax.random.uniform(keys[2 * l + 1], (do,), jnp.float32,
                                      -0.5, 0.5))

    # FWPFastLinear fast-weight deltas (zero initially); forward uses W0+dW.
    dWs = [jnp.zeros_like(w) for w in W0s]
    dbs = [jnp.zeros_like(b) for b in b0s]
    Ws = [w + dw for w, dw in zip(W0s, dWs)]
    bs = [b + db for b, db in zip(b0s, dbs)]

    out = fffastnet_forward(x, Ws, bs, tile_m=8)   # grid=(2,) at this size
    out = jax.block_until_ready(out)

    ref = jax.block_until_ready(reference_forward(x, Ws, bs))
    np.testing.assert_allclose(np.asarray(out), np.asarray(ref),
                               rtol=1e-5, atol=1e-5)
    assert out.shape == (batch, num_outs)
    np.testing.assert_allclose(np.asarray(out).sum(axis=-1),
                               np.ones(batch), rtol=1e-5, atol=1e-5)
    print("KERNEL_OK")
</pallas_src>

<mosaic_0001>
module attributes {stable_mosaic.version = 11 : i64} {
  func.func @kernel(%arg0: i32, %arg1: memref<8x16xf32, #tpu.memory_space<vmem>>, %arg2: memref<16x128xf32, #tpu.memory_space<vmem>>, %arg3: memref<1x128xf32, #tpu.memory_space<vmem>>, %arg4: memref<128x128xf32, #tpu.memory_space<vmem>>, %arg5: memref<1x128xf32, #tpu.memory_space<vmem>>, %arg6: memref<128x128xf32, #tpu.memory_space<vmem>>, %arg7: memref<1x128xf32, #tpu.memory_space<vmem>>, %arg8: memref<128x128xf32, #tpu.memory_space<vmem>>, %arg9: memref<1x128xf32, #tpu.memory_space<vmem>>, %arg10: memref<128x8xf32, #tpu.memory_space<vmem>>, %arg11: memref<1x8xf32, #tpu.memory_space<vmem>>, %arg12: memref<8x8xf32, #tpu.memory_space<vmem>>) attributes {dimension_semantics = [#tpu.dimension_semantics<parallel>], iteration_bounds = array<i64: 2>, scalar_prefetch = 0 : i64, scratch_operands = 0 : i64, tpu.core_type = #tpu.core_type<tc>, window_params = [{transform_indices = @transform_0, window_bounds = array<i64: 8, 16>}, {pipeline_mode = #tpu.pipeline_mode<synchronous>, transform_indices = @transform_1, window_bounds = array<i64: 16, 128>}, {pipeline_mode = #tpu.pipeline_mode<synchronous>, transform_indices = @transform_2, window_bounds = array<i64: 1, 128>}, {pipeline_mode = #tpu.pipeline_mode<synchronous>, transform_indices = @transform_3, window_bounds = array<i64: 128, 128>}, {pipeline_mode = #tpu.pipeline_mode<synchronous>, transform_indices = @transform_4, window_bounds = array<i64: 1, 128>}, {pipeline_mode = #tpu.pipeline_mode<synchronous>, transform_indices = @transform_5, window_bounds = array<i64: 128, 128>}, {pipeline_mode = #tpu.pipeline_mode<synchronous>, transform_indices = @transform_6, window_bounds = array<i64: 1, 128>}, {pipeline_mode = #tpu.pipeline_mode<synchronous>, transform_indices = @transform_7, window_bounds = array<i64: 128, 128>}, {pipeline_mode = #tpu.pipeline_mode<synchronous>, transform_indices = @transform_8, window_bounds = array<i64: 1, 128>}, {pipeline_mode = #tpu.pipeline_mode<synchronous>, transform_indices = @transform_9, window_bounds = array<i64: 128, 8>}, {pipeline_mode = #tpu.pipeline_mode<synchronous>, transform_indices = @transform_10, window_bounds = array<i64: 1, 8>}, {transform_indices = @transform_11, window_bounds = array<i64: 8, 8>}]} {
    %c0 = arith.constant 0 : index
    %c0_0 = arith.constant 0 : index
    %0 = vector.load %arg1[%c0, %c0_0] : memref<8x16xf32, #tpu.memory_space<vmem>>, vector<8x16xf32>
    %c0_1 = arith.constant 0 : index
    %c0_2 = arith.constant 0 : index
    %1 = vector.load %arg2[%c0_1, %c0_2] : memref<16x128xf32, #tpu.memory_space<vmem>>, vector<16x128xf32>
    %c0_3 = arith.constant 0 : index
    %c0_4 = arith.constant 0 : index
    %2 = vector.load %arg3[%c0_3, %c0_4] : memref<1x128xf32, #tpu.memory_space<vmem>>, vector<1x128xf32>
    %cst = arith.constant dense<0.000000e+00> : vector<8x128xf32>
    %3 = tpu.matmul %0, %1, %cst {dimension_numbers = #tpu.dot_dimension_numbers<[1], [0], [0], [1], [0, 0, 1, 1], [], []>} : vector<8x16xf32>, vector<16x128xf32>, vector<8x128xf32> -> vector<8x128xf32>
    %4 = vector.broadcast %2 : vector<1x128xf32> to vector<8x128xf32>
    %5 = arith.addf %3, %4 : vector<8x128xf32>
    %cst_5 = arith.constant 0.000000e+00 : f32
    %6 = vector.broadcast %cst_5 : f32 to vector<8x128xf32>
    %7 = arith.maximumf %5, %6 : vector<8x128xf32>
    %c0_6 = arith.constant 0 : index
    %c0_7 = arith.constant 0 : index
    %8 = vector.load %arg4[%c0_6, %c0_7] : memref<128x128xf32, #tpu.memory_space<vmem>>, vector<128x128xf32>
    %c0_8 = arith.constant 0 : index
    %c0_9 = arith.constant 0 : index
    %9 = vector.load %arg5[%c0_8, %c0_9] : memref<1x128xf32, #tpu.memory_space<vmem>>, vector<1x128xf32>
    %cst_10 = arith.constant dense<0.000000e+00> : vector<8x128xf32>
    %10 = tpu.matmul %7, %8, %cst_10 {dimension_numbers = #tpu.dot_dimension_numbers<[1], [0], [0], [1], [0, 0, 1, 1], [], []>} : vector<8x128xf32>, vector<128x128xf32>, vector<8x128xf32> -> vector<8x128xf32>
    %11 = vector.broadcast %9 : vector<1x128xf32> to vector<8x128xf32>
    %12 = arith.addf %10, %11 : vector<8x128xf32>
    %cst_11 = arith.constant 0.000000e+00 : f32
    %13 = vector.broadcast %cst_11 : f32 to vector<8x128xf32>
    %14 = arith.maximumf %12, %13 : vector<8x128xf32>
    %c0_12 = arith.constant 0 : index
    %c0_13 = arith.constant 0 : index
    %15 = vector.load %arg6[%c0_12, %c0_13] : memref<128x128xf32, #tpu.memory_space<vmem>>, vector<128x128xf32>
    %c0_14 = arith.constant 0 : index
    %c0_15 = arith.constant 0 : index
    %16 = vector.load %arg7[%c0_14, %c0_15] : memref<1x128xf32, #tpu.memory_space<vmem>>, vector<1x128xf32>
    %cst_16 = arith.constant dense<0.000000e+00> : vector<8x128xf32>
    %17 = tpu.matmul %14, %15, %cst_16 {dimension_numbers = #tpu.dot_dimension_numbers<[1], [0], [0], [1], [0, 0, 1, 1], [], []>} : vector<8x128xf32>, vector<128x128xf32>, vector<8x128xf32> -> vector<8x128xf32>
    %18 = vector.broadcast %16 : vector<1x128xf32> to vector<8x128xf32>
    %19 = arith.addf %17, %18 : vector<8x128xf32>
    %cst_17 = arith.constant 0.000000e+00 : f32
    %20 = vector.broadcast %cst_17 : f32 to vector<8x128xf32>
    %21 = arith.maximumf %19, %20 : vector<8x128xf32>
    %c0_18 = arith.constant 0 : index
    %c0_19 = arith.constant 0 : index
    %22 = vector.load %arg8[%c0_18, %c0_19] : memref<128x128xf32, #tpu.memory_space<vmem>>, vector<128x128xf32>
    %c0_20 = arith.constant 0 : index
    %c0_21 = arith.constant 0 : index
    %23 = vector.load %arg9[%c0_20, %c0_21] : memref<1x128xf32, #tpu.memory_space<vmem>>, vector<1x128xf32>
    %cst_22 = arith.constant dense<0.000000e+00> : vector<8x128xf32>
    %24 = tpu.matmul %21, %22, %cst_22 {dimension_numbers = #tpu.dot_dimension_numbers<[1], [0], [0], [1], [0, 0, 1, 1], [], []>} : vector<8x128xf32>, vector<128x128xf32>, vector<8x128xf32> -> vector<8x128xf32>
    %25 = vector.broadcast %23 : vector<1x128xf32> to vector<8x128xf32>
    %26 = arith.addf %24, %25 : vector<8x128xf32>
    %cst_23 = arith.constant 0.000000e+00 : f32
    %27 = vector.broadcast %cst_23 : f32 to vector<8x128xf32>
    %28 = arith.maximumf %26, %27 : vector<8x128xf32>
    %c0_24 = arith.constant 0 : index
    %c0_25 = arith.constant 0 : index
    %29 = vector.load %arg10[%c0_24, %c0_25] : memref<128x8xf32, #tpu.memory_space<vmem>>, vector<128x8xf32>
    %c0_26 = arith.constant 0 : index
    %c0_27 = arith.constant 0 : index
    %30 = vector.load %arg11[%c0_26, %c0_27] : memref<1x8xf32, #tpu.memory_space<vmem>>, vector<1x8xf32>
    %cst_28 = arith.constant dense<0.000000e+00> : vector<8x8xf32>
    %31 = tpu.matmul %28, %29, %cst_28 {dimension_numbers = #tpu.dot_dimension_numbers<[1], [0], [0], [1], [0, 0, 1, 1], [], []>} : vector<8x128xf32>, vector<128x8xf32>, vector<8x8xf32> -> vector<8x8xf32>
    %32 = vector.broadcast %30 : vector<1x8xf32> to vector<8x8xf32>
    %33 = arith.addf %31, %32 : vector<8x8xf32>
    %cst_29 = arith.constant dense<0xFF800000> : vector<8xf32>
    %34 = vector.multi_reduction <maximumf>, %33, %cst_29 [1] : vector<8x8xf32> to vector<8xf32>
    %35 = vector.shape_cast %34 : vector<8xf32> to vector<8x1xf32>
    %36 = vector.broadcast %35 : vector<8x1xf32> to vector<8x8xf32>
    %37 = arith.subf %33, %36 : vector<8x8xf32>
    %38 = math.exp %37 : vector<8x8xf32>
    %cst_30 = arith.constant dense<0.000000e+00> : vector<8xf32>
    %39 = vector.multi_reduction <add>, %38, %cst_30 [1] : vector<8x8xf32> to vector<8xf32>
    %40 = vector.shape_cast %39 : vector<8xf32> to vector<8x1xf32>
    %41 = vector.broadcast %40 : vector<8x1xf32> to vector<8x8xf32>
    %42 = arith.divf %38, %41 : vector<8x8xf32>
    %c0_31 = arith.constant 0 : index
    %c0_32 = arith.constant 0 : index
    %43 = vector.load %arg12[%c0_31, %c0_32] : memref<8x8xf32, #tpu.memory_space<vmem>>, vector<8x8xf32>
    tpu.vector_store %arg12[%c0_31, %c0_32], %42 {strides = array<i32>} : memref<8x8xf32, #tpu.memory_space<vmem>>, vector<8x8xf32>,
    return
  }
  func.func @transform_0(%arg0: i32) -> (i32, i32) {
    %c0_i32 = arith.constant 0 : i32
    %c0_i32_0 = arith.constant 0 : i32
    return %arg0, %c0_i32 : i32, i32
  }
  func.func @transform_1(%arg0: i32) -> (i32, i32) {
    %c0_i32 = arith.constant 0 : i32
    %c0_i32_0 = arith.constant 0 : i32
    %c0_i32_1 = arith.constant 0 : i32
    return %c0_i32, %c0_i32_0 : i32, i32
  }
  func.func @transform_2(%arg0: i32) -> (i32, i32) {
    %c0_i32 = arith.constant 0 : i32
    %c0_i32_0 = arith.constant 0 : i32
    %c0_i32_1 = arith.constant 0 : i32
    return %c0_i32, %c0_i32_0 : i32, i32
  }
  func.func @transform_3(%arg0: i32) -> (i32, i32) {
    %c0_i32 = arith.constant 0 : i32
    %c0_i32_0 = arith.constant 0 : i32
    %c0_i32_1 = arith.constant 0 : i32
    return %c0_i32, %c0_i32_0 : i32, i32
  }
  func.func @transform_4(%arg0: i32) -> (i32, i32) {
    %c0_i32 = arith.constant 0 : i32
    %c0_i32_0 = arith.constant 0 : i32
    %c0_i32_1 = arith.constant 0 : i32
    return %c0_i32, %c0_i32_0 : i32, i32
  }
  func.func @transform_5(%arg0: i32) -> (i32, i32) {
    %c0_i32 = arith.constant 0 : i32
    %c0_i32_0 = arith.constant 0 : i32
    %c0_i32_1 = arith.constant 0 : i32
    return %c0_i32, %c0_i32_0 : i32, i32
  }
  func.func @transform_6(%arg0: i32) -> (i32, i32) {
    %c0_i32 = arith.constant 0 : i32
    %c0_i32_0 = arith.constant 0 : i32
    %c0_i32_1 = arith.constant 0 : i32
    return %c0_i32, %c0_i32_0 : i32, i32
  }
  func.func @transform_7(%arg0: i32) -> (i32, i32) {
    %c0_i32 = arith.constant 0 : i32
    %c0_i32_0 = arith.constant 0 : i32
    %c0_i32_1 = arith.constant 0 : i32
    return %c0_i32, %c0_i32_0 : i32, i32
  }
  func.func @transform_8(%arg0: i32) -> (i32, i32) {
    %c0_i32 = arith.constant 0 : i32
    %c0_i32_0 = arith.constant 0 : i32
    %c0_i32_1 = arith.constant 0 : i32
    return %c0_i32, %c0_i32_0 : i32, i32
  }
  func.func @transform_9(%arg0: i32) -> (i32, i32) {
    %c0_i32 = arith.constant 0 : i32
    %c0_i32_0 = arith.constant 0 : i32
    %c0_i32_1 = arith.constant 0 : i32
    return %c0_i32, %c0_i32_0 : i32, i32
  }
  func.func @transform_10(%arg0: i32) -> (i32, i32) {
    %c0_i32 = arith.constant 0 : i32
    %c0_i32_0 = arith.constant 0 : i32
    %c0_i32_1 = arith.constant 0 : i32
    return %c0_i32, %c0_i32_0 : i32, i32
  }
  func.func @transform_11(%arg0: i32) -> (i32, i32) {
    %c0_i32 = arith.constant 0 : i32
    %c0_i32_0 = arith.constant 0 : i32
    return %arg0, %c0_i32 : i32, i32
  }
}

</mosaic_0001>

<bundles_post_ra>
// kernel: tpu_custom_call.1
= control target key start
LH: loop header
LB: loop body
LE: loop exit
PB: predicated region body
PF: predicated region fallthrough
CT: control target
= control target key end

     0   :  { %16 = vsyncpa [#allocation3], 0  ;;  %s1828_s0 = inlined_call_operand.vmem [shape: f32[16,16], index: 0, kind: input, shape index: {}]   ;;  %s1829_s1 = inlined_call_operand.hbm [shape: f32[16,128], index: 1, kind: input, shape index: {}]   ;;  %s1830_s2 = inlined_call_operand.vmem [shape: f32[1,128], index: 2, kind: input, shape index: {}]   ;;  %s1831_s3 = inlined_call_operand.vmem [shape: f32[128,128], index: 3, kind: input, shape index: {}]   ;;  %s1832_s4 = inlined_call_operand.vmem [shape: f32[1,128], index: 4, kind: input, shape index: {}]   ;;  %s1833_s5 = inlined_call_operand.hbm [shape: f32[128,128], index: 5, kind: input, shape index: {}]   ;;  %s1834_s6 = inlined_call_operand.vmem [shape: f32[1,128], index: 6, kind: input, shape index: {}]   ;;  %s1835_s7 = inlined_call_operand.hbm [shape: f32[128,128], index: 7, kind: input, shape index: {}]   ;;  %s1836_s8 = inlined_call_operand.vmem [shape: f32[1,128], index: 8, kind: input, shape index: {}]   ;;  %s1837_s9 = inlined_call_operand.vmem [shape: f32[128,8], index: 9, kind: input, shape index: {}]   ;;  %s1838_s10 = inlined_call_operand.vmem [shape: f32[1,8], index: 10, kind: input, shape index: {}]   ;;  %s1839_s11 = inlined_call_operand.vmem [shape: f32[16,8], index: 11, kind: output, shape index: {}]  }
   0x1   :  { %17 = vsyncpa [#allocation5], 0  ;;  %s1537_s17 = smov 0  }
   0x2 LB: > { %s1543_s18 = sadd.s32 4294967295, %s1467_s17   ;;  %p985_p0 = scmp.ge.s32.totalorder %s1467_s17, 1  ;;  %s1467_s17 = sphi %s1537_s17, %s23_s17  }
   0x3   : > { %p290_p1 = scmp.lt.s32.totalorder %s1467_s17, 3  ;;  %p1840_p2 = scmp.eq.s32.totalorder %s1543_s18, 0 }
   0x4   : > { %s1469_s20 = smov [#allocation4]   ;;  %s1470_s22 = smov [#allocation2]  }
   0x5   : > { %p1548_p3 = pnand %p985_p0, %p290_p1  ;;  %s324_s21 = sshll.u32 %s1469_s20, 4  ;;  %s325_s21 = int_to_ptr.vmem [resolvable:$true] %s324_s21 }
   0x6   : > { %s302_s23 = sshll.u32 %s1470_s22, 4  ;;  %s1471_s25 = smov [#allocation6]   ;;  %s1560_s23 = int_to_ptr.vmem [resolvable:$true] %s302_s23 }
   0x7   : > { %s1842_s19 = scalar_select %p1548_p3, 1, 0 }
   0x8   : > { %p1333_p4 = pneg %p1548_p3  ;;  %s340_s26 = sshll.u32 %s1471_s25, 4  ;;  %s1562_s26 = int_to_ptr.vmem [resolvable:$true] %s340_s26 }
   0x9   : > { %s1369_s29 = scalar_lea.hbm %s1833_s5, 2048 }
   0xa   : > { %p1556_p5 = pnand %p1840_p2, %p1333_p4  ;;  %p1370_p6 = scmp.ne.s32.totalorder %s1833_s5, %s1369_s29 }
   0xb   : > { %p1376_p10 = scmp.lt.u32.totalorder %s1369_s29, %s1833_s5 }
   0xc   : > { %p1572_p7 = pneg %p1556_p5 }
   0xe   : > { %p1372_p8 = pnand %p1572_p7, %p1370_p6 }
  0x10   : > { %p1373_p9 = pneg %p1372_p8 }
  0x12   : > { %p1378_p11 = pnand %p1376_p10, %p1373_p9 }
  0x14   : > { %1381 = shalt.err (!%p1378_p11)
}
  0x15   : > { %s1382_s16 = scalar_lea.vmem %s325_s21, 2048  ;;  %p1390_p1 = scmp.lt.s32.totalorder %s325_s21, %s325_s21 }
  0x16   : > { %p1383_p12 = scmp.ne.s32.totalorder %s325_s21, %s1382_s16  ;;  %p1391_p4 = scmp.lt.s32.totalorder %s1382_s16, %s1382_s16 }
  0x18   : > { %p1385_p13 = pnand %p1383_p12, %p1572_p7  ;;  %p1392_p2 = por %p1391_p4, %p1390_p1 }
  0x1a   : > { %p1386_p0 = pneg %p1385_p13 }
  0x1c   : > { %p1393_p3 = pnand %p1392_p2, %p1386_p0 }
  0x1e   : > { %1396 = shalt.err (!%p1393_p3)
}
  0x1f   : > { %s1472_s20 = smov 128   ;;  %s1473_s22 = smov 8  }
  0x20   : > { %1339 = dma.hbm_to_vmem [thread:$0]  (!%p1556_p5), %s1833_s5, 2048, %s325_s21, [#allocation5], %s1472_s20, %s1472_s20, %s1473_s22  }
  0x21   : > { %s1397_s30 = scalar_lea.hbm %s1829_s1, 256 }
  0x22   : > { %p1398_p2 = scmp.ne.s32.totalorder %s1829_s1, %s1397_s30  ;;  %p1404_p8 = scmp.lt.u32.totalorder %s1397_s30, %s1829_s1 }
  0x24   : > { %p1400_p3 = pnand %p1398_p2, %p1572_p7 }
  0x26   : > { %p1401_p6 = pneg %p1400_p3 }
  0x28   : > { %p1406_p9 = pnand %p1404_p8, %p1401_p6 }
  0x2a   : > { %1409 = shalt.err (!%p1406_p9)
}
  0x2b   : > { %s1410_s21 = scalar_lea.vmem %s1560_s23, 256  ;;  %p1418_p13 = scmp.lt.s32.totalorder %s1560_s23, %s1560_s23 }
  0x2c   : > { %p1411_p10 = scmp.ne.s32.totalorder %s1560_s23, %s1410_s21  ;;  %p1419_p0 = scmp.lt.s32.totalorder %s1410_s21, %s1410_s21 }
  0x2e   : > { %p1413_p11 = pnand %p1411_p10, %p1572_p7  ;;  %p1420_p1 = por %p1419_p0, %p1418_p13 }
  0x30   : > { %p1414_p12 = pneg %p1413_p11 }
  0x32   : > { %p1421_p4 = pnand %p1420_p1, %p1414_p12 }
  0x34   : > { %1424 = shalt.err (!%p1421_p4)
}
  0x35   : > { %1336 = dma.hbm_to_vmem [thread:$0]  (!%p1556_p5), %s1829_s1, 256, %s1560_s23, [#allocation3], %s1472_s20, %s1472_s20, %s1473_s22  }
  0x36   : > { %s1425_s30 = scalar_lea.hbm %s1835_s7, 2048 }
  0x37   : > { %p1426_p2 = scmp.ne.s32.totalorder %s1835_s7, %s1425_s30  ;;  %p1432_p8 = scmp.lt.u32.totalorder %s1425_s30, %s1835_s7 }
  0x39   : > { %p1428_p3 = pnand %p1426_p2, %p1572_p7 }
  0x3b   : > { %p1429_p6 = pneg %p1428_p3 }
  0x3d   : > { %p1434_p9 = pnand %p1432_p8, %p1429_p6 }
  0x3f   : > { %1437 = shalt.err (!%p1434_p9)
}
  0x40   : > { %s1438_s23 = scalar_lea.vmem %s1562_s26, 2048  ;;  %p1446_p13 = scmp.lt.s32.totalorder %s1562_s26, %s1562_s26 }
  0x41   : > { %p1439_p10 = scmp.ne.s32.totalorder %s1562_s26, %s1438_s23  ;;  %p1447_p0 = scmp.lt.s32.totalorder %s1438_s23, %s1438_s23 }
  0x43   : > { %p1441_p11 = pnand %p1439_p10, %p1572_p7  ;;  %p1448_p1 = por %p1447_p0, %p1446_p13 }
  0x45   : > { %p1442_p12 = pneg %p1441_p11 }
  0x47   : > { %p1449_p4 = pnand %p1448_p1, %p1442_p12 }
  0x49   : > { %1452 = shalt.err (!%p1449_p4)
}
  0x4a   : > { %1342 = dma.hbm_to_vmem [thread:$0]  (!%p1556_p5), %s1835_s7, 2048, %s1562_s26, [#allocation5], %s1472_s20, %s1472_s20, %s1473_s22  }
  0x4b   : > { %p1845_p2 = scmp.ne.s32.totalorder %s1842_s19, 0 }
  0x4c   : > { %p1846_p7 = scmp.eq.s32.totalorder (!%p1845_p2), %s1543_s18, 0 }
  0x4d   : > { %372 = sbr.rel (%p1845_p2) target bundleno = 1489 (0x5d1), region = 64 }
  0x54   : > { %1458 = dma.done.wait (%p1846_p7), [#allocation3], 256   ;;  %p1847_p3 = pmov %p1846_p7 }
  0x56   : > { %1460 = vsyncadd (%p1847_p3), [#allocation3], 4294967040  ;;  %p1848_p6 = pmov %p1847_p3 }
  0x57   : > { %p1849_p8 = pmov %p1847_p3 }
  0x58   : > { %1462 = dma.done.wait (%p1848_p6), [#allocation5], 4096  }
  0x59   : > { %1464 = vsyncadd (%p1849_p8), [#allocation5], 4294963200  ;;  %p418_p9 = scmp.lt.s32.totalorder %s1543_s18, 1  ;;  %v1474_v0 = vmov 0.0|0.0   ;;  %vm1475_vm0 = vmmov 0   ;;  %v1476_v1 = vmov 0.0  }
  0x5a   : > { %1222 = vmatprep.subr.bf16.mxu0 %v1474_v0  ;;  %1079 = vmatprep.mubr.msk.f32.mxu0 %vm1475_vm0, %v1476_v1  ;;  %v427_v2 = vld [vmem:[#allocation2] sm:$0xff]  ;;  %v428_v3 = vld [vmem:[#allocation2 + $0x8] sm:$0xff]  ;;  %v513_v7 = vld [vmem:[%s1831_s3 + $0x10] sm:$0xff]  ;;  %vm436_vm1 = vcmask 130048   ;;  %vm886_vm2 = vcmask 64512  }
  0x5b   : > { %s1851_s18 = smov (!%p418_p9, %s1543_s18), 1  ;;  %1225 = vmatprep.subr.bf16.mxu1 %v1474_v0  ;;  %1114 = vmatprep.mubr.msk.f32.mxu1 %vm1475_vm0, %v1476_v1  ;;  %v1223_v4 = vpack.c.bf16 %v428_v3, %v427_v2  ;;  %v511_v5 = vld [vmem:[%s1831_s3] sm:$0xff]  ;;  %v512_v6 = vld [vmem:[%s1831_s3 + $0x8] sm:$0xff]  ;;  %v514_v9 = vld [vmem:[%s1831_s3 + $0x18] sm:$0xff] }
  0x5c   : > { %s994_s19 = sshll.u32 %s1851_s18, 3  ;;  %v1226_v8 = vpack.c.bf16 %v512_v6, %v511_v5  ;;  %v1229_v11 = vpack.c.bf16 %v514_v9, %v513_v7  ;;  %v515_v12 = vld [vmem:[%s1831_s3 + $0x20] sm:$0xff]  ;;  %v516_v13 = vld [vmem:[%s1831_s3 + $0x28] sm:$0xff]  ;;  %v517_v15 = vld [vmem:[%s1831_s3 + $0x30] sm:$0xff] }
  0x5d   : > { %s421_s13 = scalar_lea.vmem %s1828_s0, %s994_s19  ;;  %1224 = vmatpush3.bf16.msra.mxu0 %v1223_v4  ;;  %v1232_v14 = vpack.c.bf16 %v516_v13, %v515_v12  ;;  %v518_v16 = vld [vmem:[%s1831_s3 + $0x38] sm:$0xff]  ;;  %v519_v18 = vld [vmem:[%s1831_s3 + $0x40] sm:$0xff]  ;;  %v520_v19 = vld [vmem:[%s1831_s3 + $0x48] sm:$0xff]  ;;  %s425_s25 = scalar_lea.vmem %s1839_s11, %s994_s19 }
  0x5e   : > { %v426_v10 = vld [vmem:[%s421_s13] sm:$0xff]  ;;  %1227 = vmatpush3.bf16.msra.mxu1 %v1226_v8  ;;  %1249 = vmatprep.subr.bf16.mxu0 %v1474_v0  ;;  %v1235_v17 = vpack.c.bf16 %v518_v16, %v517_v15  ;;  %v1238_v20 = vpack.c.bf16 %v520_v19, %v519_v18  ;;  %v521_v21 = vld [vmem:[%s1831_s3 + $0x50] sm:$0xff]  ;;  %v522_v22 = vld [vmem:[%s1831_s3 + $0x58] sm:$0xff] }
  0x5f   : > { %1228 = vmatprep.subr.bf16.mxu1 %v1474_v0  ;;  %v1241_v23 = vpack.c.bf16 %v522_v22, %v521_v21  ;;  %v523_v24 = vld [vmem:[%s1831_s3 + $0x60] sm:$0xff]  ;;  %v524_v25 = vld [vmem:[%s1831_s3 + $0x68] sm:$0xff]  ;;  %v525_v27 = vld [vmem:[%s1831_s3 + $0x70] sm:$0xff] }
  0x60   : > { %1080 = vmatmul.mubr.msk.f32.vlgmr.msra.gmra.mrb[0].mxu0 %vm436_vm1, %v426_v10  ;;  %v1244_v26 = vpack.c.bf16 %v524_v25, %v523_v24  ;;  %v526_v28 = vld [vmem:[%s1831_s3 + $0x78] sm:$0xff]  ;;  %v605_v30 = vld [vmem:[#allocation4] sm:$0xff]  ;;  %v607_v32 = vld [vmem:[#allocation4 + $0x10] sm:$0xff] }
  0x61   : > { %1149 = vmatprep.mubr.msk.f32.mxu0 %vm1475_vm0, %v1476_v1  ;;  %v1247_v29 = vpack.c.bf16 %v526_v28, %v525_v27  ;;  %v606_v31 = vld [vmem:[#allocation4 + $0x8] sm:$0xff]  ;;  %v608_v34 = vld [vmem:[#allocation4 + $0x18] sm:$0xff]  ;;  %v609_v36 = vld [vmem:[#allocation4 + $0x20] sm:$0xff] }
  0x62   : > { %1230 = vmatpush3.bf16.msra.mxu1 %v1229_v11  ;;  %v1250_v33 = vpack.c.bf16 %v606_v31, %v605_v30  ;;  %v1253_v35 = vpack.c.bf16 %v608_v34, %v607_v32  ;;  %v610_v37 = vld [vmem:[#allocation4 + $0x28] sm:$0xff]  ;;  %v611_v39 = vld [vmem:[#allocation4 + $0x30] sm:$0xff]  ;;  %v612_v40 = vld [vmem:[#allocation4 + $0x38] sm:$0xff] }
  0x63   : > { %1231 = vmatprep.subr.bf16.mxu1 %v1474_v0  ;;  %v1256_v38 = vpack.c.bf16 %v610_v37, %v609_v36  ;;  %v1259_v41 = vpack.c.bf16 %v612_v40, %v611_v39  ;;  %v613_v42 = vld [vmem:[#allocation4 + $0x40] sm:$0xff]  ;;  %v614_v43 = vld [vmem:[#allocation4 + $0x48] sm:$0xff]  ;;  %v615_v45 = vld [vmem:[#allocation4 + $0x50] sm:$0xff] }
  0x64   : > { %1251 = vmatpush3.bf16.msra.mxu0 %v1250_v33  ;;  %v1262_v44 = vpack.c.bf16 %v614_v43, %v613_v42  ;;  %v616_v46 = vld [vmem:[#allocation4 + $0x58] sm:$0xff]  ;;  %v617_v48 = vld [vmem:[#allocation4 + $0x60] sm:$0xff]  ;;  %v618_v49 = vld [vmem:[#allocation4 + $0x68] sm:$0xff] }
  0x65   : > { %1252 = vmatprep.subr.bf16.mxu0 %v1474_v0  ;;  %v1265_v47 = vpack.c.bf16 %v616_v46, %v615_v45  ;;  %v1268_v50 = vpack.c.bf16 %v618_v49, %v617_v48  ;;  %v996_v51 = vld [vmem:[%s1830_s2] ss:$0 sm:$0xff]  ;;  %v620_v57 = vld [vmem:[#allocation4 + $0x78] sm:$0xff]  ;;  %v699_v59 = vld [vmem:[#allocation6] sm:$0xff] }
  0x66   : > { %1233 = vmatpush3.bf16.msra.mxu1 %v1232_v14  ;;  %v619_v56 = vld [vmem:[#allocation4 + $0x70] sm:$0xff]  ;;  %v700_v60 = vld [vmem:[#allocation6 + $0x8] sm:$0xff]  ;;  %v702_v63 = vld [vmem:[#allocation6 + $0x18] sm:$0xff] }
  0x67   : > { %1234 = vmatprep.subr.bf16.mxu1 %v1474_v0  ;;  %v1271_v58 = vpack.c.bf16 %v620_v57, %v619_v56  ;;  %v701_v61 = vld [vmem:[#allocation6 + $0x10] sm:$0xff]  ;;  %v1274_v62 = vpack.c.bf16 %v700_v60, %v699_v59  ;;  %v703_v3 = vld [vmem:[#allocation6 + $0x20] sm:$0xff]  ;;  %v704_v4 = vld [vmem:[#allocation6 + $0x28] sm:$0xff] }
  0x68   : > { %1254 = vmatpush3.bf16.msra.mxu0 %v1253_v35  ;;  %v1277_v2 = vpack.c.bf16 %v702_v63, %v701_v61  ;;  %v1280_v5 = vpack.c.bf16 %v704_v4, %v703_v3  ;;  %v705_v6 = vld [vmem:[#allocation6 + $0x30] sm:$0xff]  ;;  %v706_v7 = vld [vmem:[#allocation6 + $0x38] sm:$0xff]  ;;  %v707_v9 = vld [vmem:[#allocation6 + $0x40] sm:$0xff] }
  0x69   : > { %1255 = vmatprep.subr.bf16.mxu0 %v1474_v0  ;;  %v1283_v8 = vpack.c.bf16 %v706_v7, %v705_v6  ;;  %v708_v10 = vld [vmem:[#allocation6 + $0x48] sm:$0xff]  ;;  %v709_v12 = vld [vmem:[#allocation6 + $0x50] sm:$0xff]  ;;  %v710_v13 = vld [vmem:[#allocation6 + $0x58] sm:$0xff] }
  0x6a   : > { %1236 = vmatpush3.bf16.msra.mxu1 %v1235_v17  ;;  %v1286_v11 = vpack.c.bf16 %v708_v10, %v707_v9  ;;  %v1289_v14 = vpack.c.bf16 %v710_v13, %v709_v12  ;;  %v711_v15 = vld [vmem:[#allocation6 + $0x60] sm:$0xff]  ;;  %v712_v16 = vld [vmem:[#allocation6 + $0x68] sm:$0xff]  ;;  %v998_v18 = vld [vmem:[%s1832_s4] ss:$0 sm:$0xff] }
  0x6b   : > { %1237 = vmatprep.subr.bf16.mxu1 %v1474_v0  ;;  %v1292_v17 = vpack.c.bf16 %v712_v16, %v711_v15  ;;  %v714_v24 = vld [vmem:[#allocation6 + $0x78] sm:$0xff]  ;;  %v795_v28 = vld [vmem:[%s1837_s9 + $0x10] sm:$0xff]  ;;  %v797_v31 = vld [vmem:[%s1837_s9 + $0x20] sm:$0xff] }
  0x6c   : > { %1257 = vmatpush3.bf16.msra.mxu0 %v1256_v38  ;;  %v794_v27 = vld [vmem:[%s1837_s9 + $0x8] sm:$0xff]  ;;  %v799_v34 = vld [vmem:[%s1837_s9 + $0x30] sm:$0xff]  ;;  %v800_v35 = vld [vmem:[%s1837_s9 + $0x38] sm:$0xff] }
  0x6d   : > { %1258 = vmatprep.subr.bf16.mxu0 %v1474_v0  ;;  %v798_v32 = vld [vmem:[%s1837_s9 + $0x28] sm:$0xff]  ;;  %v1307_v36 = vpack.c.bf16 %v800_v35, %v799_v34  ;;  %v801_v37 = vld [vmem:[%s1837_s9 + $0x40] sm:$0xff]  ;;  %v803_v40 = vld [vmem:[%s1837_s9 + $0x50] sm:$0xff] }
  0x6e   : > { %1239 = vmatpush3.bf16.msra.mxu1 %v1238_v20  ;;  %v1304_v33 = vpack.c.bf16 %v798_v32, %v797_v31  ;;  %v802_v38 = vld [vmem:[%s1837_s9 + $0x48] sm:$0xff]  ;;  %v805_v43 = vld [vmem:[%s1837_s9 + $0x60] sm:$0xff] }
  0x6f   : > { %1240 = vmatprep.subr.bf16.mxu1 %v1474_v0  ;;  %v1310_v39 = vpack.c.bf16 %v802_v38, %v801_v37  ;;  %v999_v46 = vld [vmem:[%s1834_s6] ss:$0 sm:$0xff] }
  0x70   : > { %1260 = vmatpush3.bf16.msra.mxu0 %v1259_v41  ;;  %v804_v41 = vld [vmem:[%s1837_s9 + $0x58] sm:$0xff] }
  0x71   : > { %1261 = vmatprep.subr.bf16.mxu0 %v1474_v0  ;;  %v1313_v42 = vpack.c.bf16 %v804_v41, %v803_v40 }
  0x72   : > { %1242 = vmatpush3.bf16.msra.mxu1 %v1241_v23  ;;  %v713_v23 = vld [vmem:[#allocation6 + $0x70] sm:$0xff] }
  0x73   : > { %1243 = vmatprep.subr.bf16.mxu1 %v1474_v0  ;;  %v1295_v25 = vpack.c.bf16 %v714_v24, %v713_v23 }
  0x74   : > { %1263 = vmatpush3.bf16.msra.mxu0 %v1262_v44  ;;  %v806_v44 = vld [vmem:[%s1837_s9 + $0x68] sm:$0xff] }
  0x75   : > { %1264 = vmatprep.subr.bf16.mxu0 %v1474_v0  ;;  %v1316_v45 = vpack.c.bf16 %v806_v44, %v805_v43 }
  0x76   : > { %1245 = vmatpush3.bf16.msra.mxu1 %v1244_v26  ;;  %v793_v26 = vld [vmem:[%s1837_s9] sm:$0xff] }
  0x77   : > { %1246 = vmatprep.subr.bf16.mxu1 %v1474_v0 }
  0x78   : > { %1266 = vmatpush3.bf16.msra.mxu0 %v1265_v47 }
  0x79   : > { %1267 = vmatprep.subr.bf16.mxu0 %v1474_v0 }
  0x7a   : > { %1248 = vmatpush3.bf16.msra.mxu1 %v1247_v29  ;;  %v1298_v29 = vpack.c.bf16 %v794_v27, %v793_v26 }
  0x7b   : > { %1273 = vmatprep.subr.bf16.mxu1 %v1474_v0 }
  0x7c   : > { %1269 = vmatpush3.bf16.msra.mxu0 %v1268_v50 }
  0x7d   : > { %1270 = vmatprep.subr.bf16.mxu0 %v1474_v0 }
  0x80   : > { %1272 = vmatpush3.bf16.msra.mxu0 %v1271_v58  ;;  %v1001_v58 = vld [vmem:[%s1838_s10] ss:$0 sm:$0xff] }
  0x81   : > { %1297 = vmatprep.subr.bf16.mxu0 %v1474_v0 }
 0x133   : > { %v506_v52 = vpop.f32.mrb[0].mxu0 }
 0x134   : > { %v507_v53 = vadd.f32 %v996_v51, %v506_v52  ;;  %v1081_v54 = vpop.f32.mrb[1].mxu0  ;;  %v807_v51 = vld [vmem:[%s1837_s9 + $0x70] sm:$0xff]  ;;  %v808_v52 = vld [vmem:[%s1837_s9 + $0x78] sm:$0xff] }
 0x136   : > { %v510_v55 = vmax.f32 %v507_v53, 0.0  ;;  %v1319_v53 = vpack.c.bf16 %v808_v52, %v807_v51 }
 0x138   : > { %1115 = vmatmul.mubr.f32.vlgmr.msra.gmra.mrb[0].mxu1 %v510_v55 }
 0x139   : > { %1184 = vmatprep.mubr.msk.f32.mxu1 %vm1475_vm0, %v1476_v1  ;;  %1275 = vmatpush3.bf16.msra.mxu1 %v1274_v62 }
 0x13a   : > { %1276 = vmatprep.subr.bf16.mxu1 %v1474_v0 }
 0x13d   : > { %1278 = vmatpush3.bf16.msra.mxu1 %v1277_v2 }
 0x13e   : > { %1279 = vmatprep.subr.bf16.mxu1 %v1474_v0 }
 0x141   : > { %1281 = vmatpush3.bf16.msra.mxu1 %v1280_v5 }
 0x142   : > { %1282 = vmatprep.subr.bf16.mxu1 %v1474_v0 }
 0x145   : > { %1284 = vmatpush3.bf16.msra.mxu1 %v1283_v8 }
 0x146   : > { %1285 = vmatprep.subr.bf16.mxu1 %v1474_v0 }
 0x149   : > { %1287 = vmatpush3.bf16.msra.mxu1 %v1286_v11 }
 0x14a   : > { %1288 = vmatprep.subr.bf16.mxu1 %v1474_v0 }
 0x14d   : > { %1290 = vmatpush3.bf16.msra.mxu1 %v1289_v14 }
 0x14e   : > { %1291 = vmatprep.subr.bf16.mxu1 %v1474_v0 }
 0x151   : > { %1293 = vmatpush3.bf16.msra.mxu1 %v1292_v17 }
 0x152   : > { %1294 = vmatprep.subr.bf16.mxu1 %v1474_v0 }
 0x155   : > { %1296 = vmatpush3.bf16.msra.mxu1 %v1295_v25 }
 0x20b   : > { %v600_v19 = vpop.f32.mrb[0].mxu1 }
 0x20c   : > { %v601_v20 = vadd.f32 %v998_v18, %v600_v19  ;;  %v1116_v21 = vpop.f32.mrb[1].mxu1 }
 0x20e   : > { %v604_v22 = vmax.f32 %v601_v20, 0.0 }
 0x210   : > { %1150 = vmatmul.mubr.f32.vlgmr.msra.gmra.mrb[2].mxu0 %v604_v22 }
 0x211   : > { %1219 = vmatprep.mubr.msk.f32.mxu0 %vm1475_vm0, %v1476_v1  ;;  %v796_v1 = vld [vmem:[%s1837_s9 + $0x18] sm:$0xff]  ;;  %1299 = vmatpush3.bf16.msra.mxu0 %v1298_v29 }
 0x212   : > { %v1301_v30 = vpack.c.bf16 %v796_v1, %v795_v28  ;;  %1300 = vmatprep.subr.bf16.mxu0 %v1474_v0 }
 0x215   : > { %1302 = vmatpush3.bf16.msra.mxu0 %v1301_v30 }
 0x216   : > { %1303 = vmatprep.subr.bf16.mxu0 %v1474_v0 }
 0x219   : > { %1305 = vmatpush3.bf16.msra.mxu0 %v1304_v33 }
 0x21a   : > { %1306 = vmatprep.subr.bf16.mxu0 %v1474_v0 }
 0x21d   : > { %1308 = vmatpush3.bf16.msra.mxu0 %v1307_v36 }
 0x21e   : > { %1309 = vmatprep.subr.bf16.mxu0 %v1474_v0 }
 0x221   : > { %1311 = vmatpush3.bf16.msra.mxu0 %v1310_v39 }
 0x222   : > { %1312 = vmatprep.subr.bf16.mxu0 %v1474_v0 }
 0x225   : > { %1314 = vmatpush3.bf16.msra.mxu0 %v1313_v42 }
 0x226   : > { %1315 = vmatprep.subr.bf16.mxu0 %v1474_v0 }
 0x229   : > { %1317 = vmatpush3.bf16.msra.mxu0 %v1316_v45 }
 0x22a   : > { %1318 = vmatprep.subr.bf16.mxu0 %v1474_v0  ;;  %v1000_v0 = vld [vmem:[%s1836_s8] ss:$0 sm:$0xff] }
 0x22d   : > { %1320 = vmatpush3.bf16.msra.mxu0 %v1319_v53 }
 0x2e3   : > { %v694_v47 = vpop.f32.mrb[2].mxu0 }
 0x2e4   : > { %v695_v48 = vadd.f32 %v999_v46, %v694_v47  ;;  %v1151_v49 = vpop.f32.mrb[3].mxu0 }
 0x2e6   : > { %v698_v50 = vmax.f32 %v695_v48, 0.0 }
 0x2e8   : > { %1185 = vmatmul.mubr.f32.vlgmr.msra.gmra.mrb[2].mxu1 %v698_v50 }
 0x3bb   : > { %v788_v54 = vpop.f32.mrb[2].mxu1 }
 0x3bc   : > { %v789_v55 = vadd.f32 %v1000_v0, %v788_v54  ;;  %v1186_v56 = vpop.f32.mrb[3].mxu1 }
 0x3be   : > { %v792_v57 = vmax.f32 %v789_v55, 0.0 }
 0x3c0   : > { %1220 = vmatmul.mubr.f32.vlgmr.msra.gmra.mrb[4].mxu0 %v792_v57 }
 0x493   : > { %v882_v59 = vpop.f32.mrb[4].mxu0 }
 0x494   : > { %v883_v60 = vadd.f32 %v1001_v58, %v882_v59  ;;  %v1221_v61 = vpop.f32.mrb[5].mxu0 }
 0x496   : > { %v887_v62 = vsel %vm886_vm2, %v883_v60, -inf }
 0x497   : > { %888 = vmax.xlane.f32.xlu0 %v887_v62 }
 0x524   : > { %v889_v63 = vpop.xlane.xlu0 %888 }
 0x525   : > { %v890_v2 = vsub.f32 %v883_v60, %v889_v63 }
 0x527   : > { %v891_v3 = vmul.f32 1.442695, %v890_v2 }
 0x529   : > { %1365 = vpow2.f32 %v891_v3 }
 0x533   : > { %v1366_v4 = vpop.eup %1365 }
 0x534   : > { %v893_v5 = vsel %vm886_vm2, %v1366_v4, 0.0 }
 0x535   : > { %894 = vadd.xlane.f32.xlu0 %v893_v5 }
 0x5c2   : > { %v895_v6 = vpop.xlane.xlu0 %894 }
 0x5c3   : > { %1367 = vrcp.f32 %v895_v6 }
 0x5cd   : > { %v1368_v7 = vpop.eup %1367 }
 0x5ce   : > { %v897_v8 = vmul.f32 %v1368_v7, %v1366_v4 }
 0x5d0   : > { %898 = vst.msk [vmem:[%s425_s25] sm:$0xff] %vm886_vm2, %v897_v8 }
 0x5d1 PF: > { %s23_s17 = sadd.s32 1, %s1467_s17  }
 0x5d2   : > { %p20_p5 = scmp.ge.s32.totalorder %s23_s17, 4  }
 0x5d4   :  { %22 = sbr.rel (!%p20_p5) target bundleno = 2 (0x2), region = 107 }
 0x5db   :  { %918 = vsyncpa [#allocation3], 1 }
 0x5dc   :  { %920 = vsyncpa [#allocation3 + $0x1], 1 }
 0x5dd   :  { %921 = vsyncpa [#allocation5], 1 }

</bundles_post_ra>
